<compile_context>
chip_gen: v7x
topology: tpu7x:2x2x1
jax: 0.10.0
libtpu: 0.0.40
codegen_flags: <defaults>
</compile_context>

<pallas_src>
import jax
import jax.numpy as jnp
from jax.experimental import pallas as pl
from jax.experimental.pallas import tpu as pltpu


# ----------------------------- Pallas kernels -----------------------------

def _make_tcn_kernel(num_levels, widths):
    """Fused TCN kernel: all levels + 1x1 downsample residual + final relu.

    widths[i] = T*Cout_i for level i; widths[-1] = T*Cout of the downsample.
    """

    def kernel(x_ref, *refs):
        o_ref = refs[-1]
        bias_ref = refs[-2]          # (num_levels+1, Wmax) f32, all biases collapsed
        m_refs = refs[:-2]           # kron-folded matrices, bf16

        x = x_ref[...]               # (tile, T*Cin), bf16
        h = x
        h_f32 = x.astype(jnp.float32)            # guard for the (invalid) 0-level case
        for i in range(num_levels):
            m = m_refs[i][...]                                   # (T*Cin_i, T*Cout_i)
            b = bias_ref[i:i + 1, :][:, :widths[i]]              # (1, T*Cout_i) f32
            acc = jnp.dot(h, m, preferred_element_type=jnp.float32) + b
            h_f32 = jnp.maximum(acc, 0.0)        # level ReLU (dropout == identity)
            h = h_f32.astype(jnp.bfloat16)
        md = m_refs[num_levels][...]                             # downsample matrix
        bd = bias_ref[num_levels:num_levels + 1, :][:, :widths[num_levels]]
        res = jnp.dot(x, md, preferred_element_type=jnp.float32) + bd
        o_ref[...] = jnp.maximum(h_f32 + res, 0.0)               # relu(network + downsample)

    return kernel


def _relu_kernel(x_ref, o_ref):
    # Degenerate case (downsample is None): the PyTorch forward is F.relu(x).
    o_ref[...] = jnp.maximum(x_ref[...], 0.0)


# ------------------------------ tiling helpers ------------------------------

def _round_up(n, m):
    return ((n + m - 1) // m) * m


def _row_tiling(rows, max_tile=512):
    """Return (padded_rows, tile).  Small inputs: one grid step with tile==rows
    (rounded to the 8-sublane granularity).  Large inputs: max_tile-row tiles
    with an even step count (v7x has 2 TensorCores sharing the grid)."""
    if rows <= max_tile:
        t = _round_up(max(rows, 8), 8)
        return t, t
    steps = -(-rows // max_tile)
    if steps % 2:
        steps += 1
    return steps * max_tile, max_tile


def _estimate_vmem_bytes(tile, k_in, widths, invariant_bytes):
    # x tile (bf16) + out tile (f32), double-buffered by the pipeline.
    io = 2 * tile * k_in * 2 + 2 * tile * widths[-1] * 4
    # grid-invariant operands: conservatively assume double-buffering.
    wb = 2 * invariant_bytes
    # live intermediates (f32 + bf16 copies of the widest level), with slack.
    inter = 2 * tile * max(widths) * 6
    return io + wb + inter


# ------------------------------ wrappers ------------------------------

def _relu_lane_dense(x):
    """relu(x) as a lane-dense Pallas elementwise kernel (pad-and-slice)."""
    orig_shape = x.shape
    flat = x.reshape(-1)
    n = flat.shape[0]
    cols = 512 if n >= 512 * 64 else 128
    r = -(-n // cols)
    padded_rows, tile = _row_tiling(r)
    buf = jnp.pad(flat, (0, padded_rows * cols - n)).reshape(padded_rows, cols)
    out = pl.pallas_call(
        _relu_kernel,
        out_shape=jax.ShapeDtypeStruct((padded_rows, cols), x.dtype),
        grid_spec=pltpu.PrefetchScalarGridSpec(
            num_scalar_prefetch=0, grid=(padded_rows // tile,),
            in_specs=[pl.BlockSpec((tile, cols), lambda i: (i, 0))],
            out_specs=pl.BlockSpec((tile, cols), lambda i: (i, 0))),
        compiler_params=pltpu.CompilerParams(dimension_semantics=("parallel",)),
    )(buf)
    return out.reshape(-1)[:n].reshape(orig_shape)


def pack_params(params, T):
    """Fold each causal dilated conv level into a (T*Cin, T*Cout) block matrix
    and collapse all biases into a single (num_levels+1, Wmax) f32 array."""
    if params['wd'] is None:
        return dict(mats=None, bias=None)
    eye_t = jnp.eye(T, dtype=jnp.float32)
    mats, bias_rows = [], []
    for i, (w0, w1, b) in enumerate(params['levels']):
        d = 2 ** i
        shift = jnp.eye(T, T, k=d, dtype=jnp.float32)      # S[t, t+d] = 1 -> taps x[t-d]
        m = jnp.kron(eye_t, w1) + jnp.kron(shift, w0)       # (T*cin, T*cout)
        mats.append(m.astype(jnp.bfloat16))
        bias_rows.append(jnp.tile(b, T))
    mats.append(jnp.kron(eye_t, params['wd']).astype(jnp.bfloat16))
    bias_rows.append(jnp.tile(params['bd'], T))
    wmax = max(int(r.shape[0]) for r in bias_rows)
    bias = jnp.stack([jnp.pad(r, (0, wmax - r.shape[0])) for r in bias_rows])
    return dict(mats=mats, bias=bias.astype(jnp.float32))


def temporal_conv_net(x, packed):
    """TemporalConvNet_.forward.  x: (B, N, T, Cin) float32 (torch layout pre-permute)."""
    B, N, T, Cin = x.shape

    if packed['mats'] is None:
        # num_inputs == num_channels[-1]: the module degenerates to relu(x).
        return _relu_lane_dense(x)

    mats = packed['mats']
    bias_all = packed['bias']
    num_levels = len(mats) - 1
    widths = tuple(int(m.shape[1]) for m in mats)            # static (from shapes)
    Cout = widths[-1] // T
    k_in = T * Cin

    rows = B * N
    invariant_bytes = sum(m.size * 2 for m in mats) + bias_all.size * 4

    # Pick the row tile: start at 512 and shrink only if the VMEM footprint of
    # the kron weights + IO tiles would blow the budget (v7x VMEM = 64 MiB).
    budget = 40 * 1024 * 1024
    max_tile = 512
    while max_tile > 8 and _estimate_vmem_bytes(max_tile, k_in, widths,
                                                invariant_bytes) > budget:
        max_tile //= 2
    padded_rows, tile = _row_tiling(rows, max_tile)
    grid = (padded_rows // tile,)
    est = _estimate_vmem_bytes(tile, k_in, widths, invariant_bytes)
    vmem_limit = int(min(60 * 1024 * 1024, max(32 * 1024 * 1024, 2 * est)))
    cparams = pltpu.CompilerParams(dimension_semantics=("parallel",),
                                   vmem_limit_bytes=vmem_limit)

    x2d = x.reshape(rows, k_in).astype(jnp.bfloat16)          # lane-dense rows, bf16
    if padded_rows != rows:
        x2d = jnp.pad(x2d, ((0, padded_rows - rows), (0, 0)))

    operands = [x2d]
    in_specs = [pl.BlockSpec((tile, k_in), lambda i: (i, 0))]
    for m in mats:
        # Constant index_map -> Pallas does not re-DMA these across grid steps.
        operands.append(m)
        in_specs.append(pl.BlockSpec(m.shape, lambda i: (0, 0)))
    operands.append(bias_all)
    in_specs.append(pl.BlockSpec(bias_all.shape, lambda i: (0, 0)))

    out = pl.pallas_call(
        _make_tcn_kernel(num_levels, widths),
        out_shape=jax.ShapeDtypeStruct((padded_rows, T * Cout), jnp.float32),
        grid_spec=pltpu.PrefetchScalarGridSpec(
            num_scalar_prefetch=0, grid=grid,
            in_specs=in_specs,
            out_specs=pl.BlockSpec((tile, T * Cout), lambda i: (i, 0))),
        compiler_params=cparams,
    )(*operands)
    return out[:rows].reshape(B, N, T, Cout)


# ------------------------------ parameters ------------------------------

def init_params(key, num_inputs, num_channels):
    """Random Conv2d-equivalent weights.  For level i (kernel (1,2), dilation 2^i):
       w0[ci, co] == conv.weight[co, ci, 0, 0]  (tap on x[t - dilation])
       w1[ci, co] == conv.weight[co, ci, 0, 1]  (tap on x[t])
    """
    keys = iter(jax.random.split(key, 4 * len(num_channels) + 4))
    nk = lambda: next(keys)
    levels = []
    cin = num_inputs
    for cout in num_channels:
        w0 = 0.1 * jax.random.normal(nk(), (cin, cout), jnp.float32)
        w1 = 0.1 * jax.random.normal(nk(), (cin, cout), jnp.float32)
        b = 0.1 * jax.random.normal(nk(), (cout,), jnp.float32)
        levels.append((w0, w1, b))
        cin = cout
    if num_inputs != num_channels[-1]:
        wd = 0.1 * jax.random.normal(nk(), (num_inputs, num_channels[-1]), jnp.float32)
        bd = 0.1 * jax.random.normal(nk(), (num_channels[-1],), jnp.float32)
    else:
        wd, bd = None, None
    return dict(levels=levels, wd=wd, bd=bd)


# ------------------------------ pure-JAX reference ------------------------------

def reference_forward(x, params):
    B, N, T, _ = x.shape
    if params['wd'] is None:
        return jnp.maximum(x, 0.0)
    cur = x
    for i, (w0, w1, b) in enumerate(params['levels']):
        d = 2 ** i
        prev = jnp.concatenate(
            [jnp.zeros((B, N, d, cur.shape[-1]), jnp.float32), cur[:, :, :T - d, :]], axis=2)
        cur = jnp.maximum(jnp.einsum('bntc,cd->bntd', cur, w1)
                          + jnp.einsum('bntc,cd->bntd', prev, w0) + b, 0.0)
    res = jnp.einsum('bntc,cd->bntd', x, params['wd']) + params['bd']
    return jnp.maximum(cur + res, 0.0)


# ------------------------------ main ------------------------------

if __name__ == "__main__":
    B, N, T, C_IN = 2, 16, 12, 4
    NUM_CHANNELS = [16, 32]          # num_inputs != num_channels[-1] -> downsample active

    key = jax.random.PRNGKey(0)
    kx, kp, kp2, kx3 = jax.random.split(key, 4)
    x = jax.random.normal(kx, (B, N, T, C_IN), jnp.float32)

    params = init_params(kp, C_IN, NUM_CHANNELS)
    packed = pack_params(params, T)
    fwd = jax.jit(temporal_conv_net)

    # 1) Small shape: rows=32 -> single grid step, tile=32.
    out = jax.block_until_ready(fwd(x, packed))
    ref = reference_forward(x, params)
    assert out.shape == (B, N, T, NUM_CHANNELS[-1]), out.shape
    err = float(jnp.max(jnp.abs(out - ref)))
    assert bool(jnp.allclose(out, ref, rtol=5e-2, atol=5e-2)), f"max abs err = {err}"

    # 2) Larger shape: rows=600 -> pad-and-slice to 2 x 512-row tiles (even grid).
    x3 = jax.random.normal(kx3, (3, 200, T, C_IN), jnp.float32)
    out3 = jax.block_until_ready(fwd(x3, packed))
    ref3 = reference_forward(x3, params)
    err3 = float(jnp.max(jnp.abs(out3 - ref3)))
    assert bool(jnp.allclose(out3, ref3, rtol=5e-2, atol=5e-2)), f"max abs err = {err3}"

    # 3) Degenerate configuration: num_inputs == num_channels[-1] -> downsample is None,
    # and (by the original forward's conditional-expression precedence) output == relu(x).
    params2 = init_params(kp2, C_IN, [C_IN, C_IN])
    packed2 = pack_params(params2, T)
    out2 = jax.block_until_ready(fwd(x, packed2))
    assert bool(jnp.allclose(out2, jnp.maximum(x, 0.0), rtol=1e-6, atol=1e-6))

    print("KERNEL_OK")
</pallas_src>

<mosaic_0001>
module attributes {stable_mosaic.version = 11 : i64} {
  func.func @kernel(%arg0: i32, %arg1: memref<32x48xbf16, #tpu.memory_space<vmem>>, %arg2: memref<48x192xbf16, #tpu.memory_space<vmem>>, %arg3: memref<192x384xbf16, #tpu.memory_space<vmem>>, %arg4: memref<48x384xbf16, #tpu.memory_space<vmem>>, %arg5: memref<3x384xf32, #tpu.memory_space<vmem>>, %arg6: memref<32x384xf32, #tpu.memory_space<vmem>>) attributes {dimension_semantics = [#tpu.dimension_semantics<parallel>], iteration_bounds = array<i64: 1>, scalar_prefetch = 0 : i64, scratch_operands = 0 : i64, tpu.core_type = #tpu.core_type<tc>, window_params = [{transform_indices = @transform_0, window_bounds = array<i64: 32, 48>}, {pipeline_mode = #tpu.pipeline_mode<synchronous>, transform_indices = @transform_1, window_bounds = array<i64: 48, 192>}, {pipeline_mode = #tpu.pipeline_mode<synchronous>, transform_indices = @transform_2, window_bounds = array<i64: 192, 384>}, {pipeline_mode = #tpu.pipeline_mode<synchronous>, transform_indices = @transform_3, window_bounds = array<i64: 48, 384>}, {pipeline_mode = #tpu.pipeline_mode<synchronous>, transform_indices = @transform_4, window_bounds = array<i64: 3, 384>}, {transform_indices = @transform_5, window_bounds = array<i64: 32, 384>}]} {
    %c0 = arith.constant 0 : index
    %c0_0 = arith.constant 0 : index
    %0 = vector.load %arg1[%c0, %c0_0] : memref<32x48xbf16, #tpu.memory_space<vmem>>, vector<32x48xbf16>
    %c0_1 = arith.constant 0 : index
    %c0_2 = arith.constant 0 : index
    %1 = vector.load %arg2[%c0_1, %c0_2] : memref<48x192xbf16, #tpu.memory_space<vmem>>, vector<48x192xbf16>
    %c0_3 = arith.constant 0 : index
    %c0_4 = arith.constant 0 : index
    %2 = vector.load %arg5[%c0_3, %c0_4] : memref<3x384xf32, #tpu.memory_space<vmem>>, vector<1x384xf32>
    %3 = vector.extract_strided_slice %2 {offsets = [0, 0], sizes = [1, 192], strides = [1, 1]} : vector<1x384xf32> to vector<1x192xf32>
    %cst = arith.constant dense<0.000000e+00> : vector<32x192xf32>
    %4 = tpu.matmul %0, %1, %cst {dimension_numbers = #tpu.dot_dimension_numbers<[1], [0], [0], [1], [0, 0, 1, 1], [], []>} : vector<32x48xbf16>, vector<48x192xbf16>, vector<32x192xf32> -> vector<32x192xf32>
    %5 = vector.broadcast %3 : vector<1x192xf32> to vector<32x192xf32>
    %6 = arith.addf %4, %5 : vector<32x192xf32>
    %cst_5 = arith.constant 0.000000e+00 : f32
    %7 = vector.broadcast %cst_5 : f32 to vector<32x192xf32>
    %8 = arith.maximumf %6, %7 : vector<32x192xf32>
    %9 = arith.truncf %8 : vector<32x192xf32> to vector<32x192xbf16>
    %c0_6 = arith.constant 0 : index
    %c0_7 = arith.constant 0 : index
    %10 = vector.load %arg3[%c0_6, %c0_7] : memref<192x384xbf16, #tpu.memory_space<vmem>>, vector<192x384xbf16>
    %c1 = arith.constant 1 : index
    %c0_8 = arith.constant 0 : index
    %11 = vector.load %arg5[%c1, %c0_8] : memref<3x384xf32, #tpu.memory_space<vmem>>, vector<1x384xf32>
    %cst_9 = arith.constant dense<0.000000e+00> : vector<32x384xf32>
    %12 = tpu.matmul %9, %10, %cst_9 {dimension_numbers = #tpu.dot_dimension_numbers<[1], [0], [0], [1], [0, 0, 1, 1], [], []>} : vector<32x192xbf16>, vector<192x384xbf16>, vector<32x384xf32> -> vector<32x384xf32>
    %13 = vector.broadcast %11 : vector<1x384xf32> to vector<32x384xf32>
    %14 = arith.addf %12, %13 : vector<32x384xf32>
    %cst_10 = arith.constant 0.000000e+00 : f32
    %15 = vector.broadcast %cst_10 : f32 to vector<32x384xf32>
    %16 = arith.maximumf %14, %15 : vector<32x384xf32>
    %c0_11 = arith.constant 0 : index
    %c0_12 = arith.constant 0 : index
    %17 = vector.load %arg4[%c0_11, %c0_12] : memref<48x384xbf16, #tpu.memory_space<vmem>>, vector<48x384xbf16>
    %c2 = arith.constant 2 : index
    %c0_13 = arith.constant 0 : index
    %18 = vector.load %arg5[%c2, %c0_13] : memref<3x384xf32, #tpu.memory_space<vmem>>, vector<1x384xf32>
    %cst_14 = arith.constant dense<0.000000e+00> : vector<32x384xf32>
    %19 = tpu.matmul %0, %17, %cst_14 {dimension_numbers = #tpu.dot_dimension_numbers<[1], [0], [0], [1], [0, 0, 1, 1], [], []>} : vector<32x48xbf16>, vector<48x384xbf16>, vector<32x384xf32> -> vector<32x384xf32>
    %20 = vector.broadcast %18 : vector<1x384xf32> to vector<32x384xf32>
    %21 = arith.addf %19, %20 : vector<32x384xf32>
    %22 = arith.addf %16, %21 : vector<32x384xf32>
    %cst_15 = arith.constant 0.000000e+00 : f32
    %23 = vector.broadcast %cst_15 : f32 to vector<32x384xf32>
    %24 = arith.maximumf %22, %23 : vector<32x384xf32>
    %c0_16 = arith.constant 0 : index
    %c0_17 = arith.constant 0 : index
    %25 = vector.load %arg6[%c0_16, %c0_17] : memref<32x384xf32, #tpu.memory_space<vmem>>, vector<32x384xf32>
    tpu.vector_store %arg6[%c0_16, %c0_17], %24 {strides = array<i32>} : memref<32x384xf32, #tpu.memory_space<vmem>>, vector<32x384xf32>,
    return
  }
  func.func @transform_0(%arg0: i32) -> (i32, i32) {
    %c0_i32 = arith.constant 0 : i32
    %c0_i32_0 = arith.constant 0 : i32
    return %arg0, %c0_i32 : i32, i32
  }
  func.func @transform_1(%arg0: i32) -> (i32, i32) {
    %c0_i32 = arith.constant 0 : i32
    %c0_i32_0 = arith.constant 0 : i32
    %c0_i32_1 = arith.constant 0 : i32
    return %c0_i32, %c0_i32_0 : i32, i32
  }
  func.func @transform_2(%arg0: i32) -> (i32, i32) {
    %c0_i32 = arith.constant 0 : i32
    %c0_i32_0 = arith.constant 0 : i32
    %c0_i32_1 = arith.constant 0 : i32
    return %c0_i32, %c0_i32_0 : i32, i32
  }
  func.func @transform_3(%arg0: i32) -> (i32, i32) {
    %c0_i32 = arith.constant 0 : i32
    %c0_i32_0 = arith.constant 0 : i32
    %c0_i32_1 = arith.constant 0 : i32
    return %c0_i32, %c0_i32_0 : i32, i32
  }
  func.func @transform_4(%arg0: i32) -> (i32, i32) {
    %c0_i32 = arith.constant 0 : i32
    %c0_i32_0 = arith.constant 0 : i32
    %c0_i32_1 = arith.constant 0 : i32
    return %c0_i32, %c0_i32_0 : i32, i32
  }
  func.func @transform_5(%arg0: i32) -> (i32, i32) {
    %c0_i32 = arith.constant 0 : i32
    %c0_i32_0 = arith.constant 0 : i32
    return %arg0, %c0_i32 : i32, i32
  }
}

</mosaic_0001>

<bundles_post_ra>
// kernel: temporal_conv_net.1
= control target key start
LH: loop header
LB: loop body
LE: loop exit
PB: predicated region body
PF: predicated region fallthrough
CT: control target
= control target key end

     0   :  { %10 = vsyncpa [#allocation3], 0  ;;  %s1289_s0 = inlined_call_operand.vmem [shape: bf16[32,48], index: 0, kind: input, shape index: {}]   ;;  %s1290_s1 = inlined_call_operand.hbm [shape: bf16[48,192], index: 1, kind: input, shape index: {}]   ;;  %s1291_s2 = inlined_call_operand.vmem [shape: bf16[192,384], index: 2, kind: input, shape index: {}]   ;;  %s1292_s3 = inlined_call_operand.vmem [shape: bf16[48,384], index: 3, kind: input, shape index: {}]   ;;  %s1293_s4 = inlined_call_operand.hbm [shape: f32[3,384], index: 4, kind: input, shape index: {}]   ;;  %s1294_s5 = inlined_call_operand.vmem [shape: f32[32,384], index: 5, kind: output, shape index: {}]  }
   0x1   :  { %11 = vsyncpa [#allocation5], 0  ;;  %s984_s18 = smov [#allocation2]   ;;  %s936_s22 = scalar_lea.hbm %s1290_s1, 768 }
   0x2   :  { %s19_s19 = sshll.u32 %s984_s18, 4  ;;  %p937_p0 = scmp.ne.s32.totalorder %s1290_s1, %s936_s22  ;;  %s20_s19 = int_to_ptr.vmem [resolvable:$true] %s19_s19 }
   0x3   :  { %p940_p1 = scmp.lt.u32.totalorder %s936_s22, %s1290_s1 }
   0x5   :  { %p942_p2 = pnand %p940_p1, %p937_p0 }
   0x7   :  { %945 = shalt.err (!%p942_p2)
}
   0x8   :  { %s946_s27 = scalar_lea.vmem %s20_s19, 768  ;;  %p951_p4 = scmp.lt.s32.totalorder %s20_s19, %s20_s19 }
   0x9   :  { %p947_p3 = scmp.ne.s32.totalorder %s20_s19, %s946_s27  ;;  %p952_p5 = scmp.lt.s32.totalorder %s946_s27, %s946_s27 }
   0xb   :  { %p953_p6 = por %p952_p5, %p951_p4 }
   0xd   :  { %p954_p7 = pnand %p953_p6, %p947_p3 }
   0xf   :  { %957 = shalt.err (!%p954_p7)
}
  0x10   :  { %s985_s28 = smov 128   ;;  %s986_s29 = smov 8  }
  0x11   :  { %25 = dma.hbm_to_vmem [thread:$0]  %s1290_s1, 768, %s20_s19, [#allocation3], %s985_s28, %s985_s28, %s986_s29  }
  0x12   :  { %s987_s7 = smov [#allocation4]   ;;  %s958_s11 = scalar_lea.hbm %s1293_s4, 192 }
  0x13   :  { %s36_s8 = sshll.u32 %s987_s7, 4  ;;  %p959_p8 = scmp.ne.s32.totalorder %s1293_s4, %s958_s11  ;;  %s37_s8 = int_to_ptr.vmem [resolvable:$true] %s36_s8 }
  0x14   :  { %p962_p9 = scmp.lt.u32.totalorder %s958_s11, %s1293_s4 }
  0x16   :  { %p964_p10 = pnand %p962_p9, %p959_p8 }
  0x18   :  { %967 = shalt.err (!%p964_p10)
}
  0x19   :  { %s968_s16 = scalar_lea.vmem %s37_s8, 192  ;;  %p973_p12 = scmp.lt.s32.totalorder %s37_s8, %s37_s8 }
  0x1a   :  { %p969_p11 = scmp.ne.s32.totalorder %s37_s8, %s968_s16  ;;  %p974_p13 = scmp.lt.s32.totalorder %s968_s16, %s968_s16 }
  0x1c   :  { %p975_p0 = por %p974_p13, %p973_p12 }
  0x1e   :  { %p976_p1 = pnand %p975_p0, %p969_p11 }
  0x20   :  { %979 = shalt.err (!%p976_p1)
}
  0x21   :  { %39 = dma.hbm_to_vmem [thread:$0]  %s1293_s4, 192, %s37_s8, [#allocation5]  }
  0x22   :  { %980 = dma.done.wait [#allocation3], 768  }
  0x23   :  { %981 = vsyncadd [#allocation3], 4294966528 }
  0x24   :  { %982 = dma.done.wait [#allocation5], 192  }
  0x25   :  { %983 = vsyncadd [#allocation5], 4294967104  ;;  %v988_v0 = vmov 0   ;;  %v865_v1 = vld [vmem:[#allocation2 + $0x4] ss:$8 sps:$4 sm:$0xff]   ;;  %vm109_vm0 = vcmask 392192   ;;  %v59_v47 = vlaneseq }
  0x26   :  { %148 = vmatprep.mubr.bf16.mxu0 %v988_v0  ;;  %v867_v2 = vld [vmem:[#allocation2] ss:$8 sps:$4 sm:$0xff]   ;;  %116 = vmatprep.subr.bf16.mxu0 %v865_v1  ;;  %v868_v3 = vld [vmem:[#allocation2 + $0x14] ss:$8 sps:$4 sm:$0xff]   ;;  %v870_v4 = vld [vmem:[#allocation2 + $0x10] ss:$8 sps:$4 sm:$0xff]  }
  0x27   :  { %117 = vmatpush1.bf16.msra.mxu0 %v867_v2  ;;  %v871_v5 = vld [vmem:[#allocation2 + $0x24] ss:$8 sps:$4 sm:$0xff]   ;;  %v873_v6 = vld [vmem:[#allocation2 + $0x20] ss:$8 sps:$4 sm:$0xff]   ;;  %v886_v14 = vld [vmem:[%s1291_s2 + $0x30] ss:$12 sps:$4 sm:$0xff]  }
  0x28   :  { %118 = vmatprep.subr.bf16.mxu0 %v868_v3  ;;  %v876_v7 = vld [vmem:[%s1291_s2 + $0x4] ss:$12 sps:$4 sm:$0xff]   ;;  %v878_v8 = vld [vmem:[%s1291_s2] ss:$12 sps:$4 sm:$0xff]   ;;  %v880_v9 = vld [vmem:[%s1291_s2 + $0x1c] ss:$12 sps:$4 sm:$0xff]  }
  0x29   :  { %446 = vmatprep.subr.bf16.mxu1 %v876_v7  ;;  %v882_v10 = vld [vmem:[%s1291_s2 + $0x18] ss:$12 sps:$4 sm:$0xff]   ;;  %v879_v12 = vld [vmem:[%s1291_s2 + $0x8] ss:$12 sps:$4 sm:$0xff]   ;;  %v883_v16 = vld [vmem:[%s1291_s2 + $0x20] ss:$12 sps:$4 sm:$0xff]  }
  0x2a   :  { %447 = vmatpush1.bf16.msra.mxu1 %v878_v8  ;;  %v1059_v11 = vld [vmem:[%s1289_s0] sm:$0xff]   ;;  %v888_v15 = vld [vmem:[%s1291_s2 + $0x4c] ss:$12 sps:$4 sm:$0xff]   ;;  %v890_v17 = vld [vmem:[%s1291_s2 + $0x48] ss:$12 sps:$4 sm:$0xff]   ;;  %v1185_v48 = vshrl.u32 %v59_v47, 7 }
  0x2b   :  { %119 = vmatpush1.bf16.msra.mxu0 %v870_v4  ;;  %448 = vmatprep.subr.bf16.mxu1 %v880_v9  ;;  %v884_v13 = vld [vmem:[%s1291_s2 + $0x34] ss:$12 sps:$4 sm:$0xff]   ;;  %v1087_v18 = vld [vmem:[%s1289_s0 + $0x8] sm:$0xff]   ;;  %v892_v19 = vld [vmem:[%s1291_s2 + $0x64] ss:$12 sps:$4 sm:$0xff]   ;;  %vm439_vm1 = vcmask 523264  }
  0x2c   :  { %120 = vmatprep.subr.bf16.mxu0 %v871_v5  ;;  %v887_v20 = vld [vmem:[%s1291_s2 + $0x38] ss:$12 sps:$4 sm:$0xff]   ;;  %v894_v21 = vld [vmem:[%s1291_s2 + $0x60] ss:$12 sps:$4 sm:$0xff]   ;;  %v896_v22 = vld [vmem:[%s1291_s2 + $0x7c] ss:$12 sps:$4 sm:$0xff]  }
  0x2d   :  { %v891_v23 = vld [vmem:[%s1291_s2 + $0x50] ss:$12 sps:$4 sm:$0xff]   ;;  %v898_v24 = vld [vmem:[%s1291_s2 + $0x78] ss:$12 sps:$4 sm:$0xff]   ;;  %v900_v25 = vld [vmem:[%s1291_s2 + $0x94] ss:$12 sps:$4 sm:$0xff]  }
  0x2e   :  { %449 = vmatpush1.bf16.msra.mxu1 %v882_v10  ;;  %v895_v26 = vld [vmem:[%s1291_s2 + $0x68] ss:$12 sps:$4 sm:$0xff]   ;;  %v902_v27 = vld [vmem:[%s1291_s2 + $0x90] ss:$12 sps:$4 sm:$0xff]   ;;  %v904_v28 = vld [vmem:[%s1291_s2 + $0xac] ss:$12 sps:$4 sm:$0xff]  }
  0x2f   :  { %121 = vmatpush1.bf16.msra.mxu0 %v873_v6  ;;  %450 = vmatprep.subr.bf16.mxu1 %v884_v13  ;;  %v899_v29 = vld [vmem:[%s1291_s2 + $0x80] ss:$12 sps:$4 sm:$0xff]   ;;  %v906_v30 = vld [vmem:[%s1291_s2 + $0xa8] ss:$12 sps:$4 sm:$0xff]   ;;  %v908_v31 = vld [vmem:[%s1291_s2 + $0xc4] ss:$12 sps:$4 sm:$0xff]  }
  0x30   :  { %499 = vmatprep.subr.bf16.mxu0 %v988_v0  ;;  %v903_v32 = vld [vmem:[%s1291_s2 + $0x98] ss:$12 sps:$4 sm:$0xff]   ;;  %v910_v33 = vld [vmem:[%s1291_s2 + $0xc0] ss:$12 sps:$4 sm:$0xff]   ;;  %v912_v34 = vld [vmem:[%s1291_s2 + $0xdc] ss:$12 sps:$4 sm:$0xff]  }
  0x31   :  { %v907_v35 = vld [vmem:[%s1291_s2 + $0xb0] ss:$12 sps:$4 sm:$0xff]   ;;  %v914_v36 = vld [vmem:[%s1291_s2 + $0xd8] ss:$12 sps:$4 sm:$0xff]   ;;  %v911_v37 = vld [vmem:[%s1291_s2 + $0xc8] ss:$12 sps:$4 sm:$0xff]  }
  0x32   :  { %790 = vmatmul.mubr.msk.bf16.vlgmr.msra.gmra.mrb[0].mxu0 %vm109_vm0, %v1059_v11  ;;  %451 = vmatpush1.bf16.msra.mxu1 %v886_v14  ;;  %v915_v38 = vld [vmem:[%s1291_s2 + $0xe0] ss:$12 sps:$4 sm:$0xff]   ;;  %v918_v40 = vld [vmem:[%s1291_s2 + $0xf0] ss:$12 sps:$4 sm:$0xff]   ;;  %v919_v41 = vld [vmem:[%s1291_s2 + $0xf8] ss:$12 sps:$4 sm:$0xff]  }
  0x33   :  { %158 = vmatprep.mubr.bf16.mxu0 %v988_v0  ;;  %500 = vmatpush1.bf16.msra.mxu0 %v879_v12  ;;  %v916_v39 = vld [vmem:[%s1291_s2 + $0xf4] ss:$12 sps:$4 sm:$0xff]   ;;  %v920_v42 = vld [vmem:[%s1291_s2 + $0x10c] ss:$12 sps:$4 sm:$0xff]   ;;  %v923_v44 = vld [vmem:[%s1291_s2 + $0x110] ss:$12 sps:$4 sm:$0xff]  }
  0x34   :  { %501 = vmatprep.subr.bf16.mxu0 %v988_v0  ;;  %452 = vmatprep.subr.bf16.mxu1 %v888_v15  ;;  %v922_v43 = vld [vmem:[%s1291_s2 + $0x108] ss:$12 sps:$4 sm:$0xff]   ;;  %v926_v45 = vld [vmem:[%s1292_s3 + $0x4] ss:$12 sps:$4 sm:$0xff]   ;;  %v1188_v49 = vsub.s32 0, %v1185_v48  ;;  %v1191_v51 = vsub.s32 1, %v1185_v48 }
  0x35   :  { %v927_v46 = vld [vmem:[%s1292_s3 + $0x8] ss:$12 sps:$4 sm:$0xff]   ;;  %v924_v6 = vld [vmem:[%s1292_s3] ss:$12 sps:$4 sm:$0xff]  }
  0x36   :  { %453 = vmatpush1.bf16.msra.mxu1 %v890_v17  ;;  %v57_v50 = vld [vmem:[#allocation4] ss:$4 sm:$0x7]  ;;  %v930_v9 = vld [vmem:[%s1292_s3 + $0x1c] ss:$12 sps:$4 sm:$0xff]  }
  0x37   :  { %502 = vmatpush1.bf16.msra.mxu0 %v883_v16  ;;  %454 = vmatprep.subr.bf16.mxu1 %v892_v19  ;;  %v62_v52 = vrot.slane %v57_v50, %v1188_v49  ;;  %v66_v53 = vrot.slane %v57_v50, %v1191_v51  ;;  %v931_v10 = vld [vmem:[%s1292_s3 + $0x20] ss:$12 sps:$4 sm:$0xff]   ;;  %v928_v17 = vld [vmem:[%s1292_s3 + $0x18] ss:$12 sps:$4 sm:$0xff]  }
  0x38   :  { %503 = vmatprep.subr.bf16.mxu0 %v988_v0 }
  0x3a   :  { %791 = vmatmul.mubr.msk.bf16.gmra.mrb[4].mxu0 %vm109_vm0, %v1087_v18  ;;  %455 = vmatpush1.bf16.msra.mxu1 %v894_v21  ;;  %v934_v21 = vld [vmem:[%s1292_s3 + $0x34] ss:$12 sps:$4 sm:$0xff]  }
  0x3b   :  { %504 = vmatpush1.bf16.msra.mxu0 %v887_v20  ;;  %456 = vmatprep.subr.bf16.mxu1 %v896_v22  ;;  %v935_v22 = vld [vmem:[%s1292_s3 + $0x38] ss:$12 sps:$4 sm:$0xff]  }
  0x3c   :  { %505 = vmatprep.subr.bf16.mxu0 %v988_v0 }
  0x3e   :  { %457 = vmatpush1.bf16.msra.mxu1 %v898_v24 }
  0x3f   :  { %506 = vmatpush1.bf16.msra.mxu0 %v891_v23  ;;  %458 = vmatprep.subr.bf16.mxu1 %v900_v25 }
  0x40   :  { %507 = vmatprep.subr.bf16.mxu0 %v988_v0 }
  0x42   :  { %459 = vmatpush1.bf16.msra.mxu1 %v902_v27  ;;  %v932_v27 = vld [vmem:[%s1292_s3 + $0x30] ss:$12 sps:$4 sm:$0xff]  }
  0x43   :  { %508 = vmatpush1.bf16.msra.mxu0 %v895_v26  ;;  %460 = vmatprep.subr.bf16.mxu1 %v904_v28 }
  0x44   :  { %509 = vmatprep.subr.bf16.mxu0 %v988_v0 }
  0x46   :  { %461 = vmatpush1.bf16.msra.mxu1 %v906_v30 }
  0x47   :  { %510 = vmatpush1.bf16.msra.mxu0 %v899_v29  ;;  %462 = vmatprep.subr.bf16.mxu1 %v908_v31 }
  0x48   :  { %511 = vmatprep.subr.bf16.mxu0 %v988_v0 }
  0x4a   :  { %463 = vmatpush1.bf16.msra.mxu1 %v910_v33 }
  0x4b   :  { %512 = vmatpush1.bf16.msra.mxu0 %v903_v32  ;;  %464 = vmatprep.subr.bf16.mxu1 %v912_v34  ;;  %v242_v34 = vsub.s32 2, %v1185_v48 }
  0x4c   :  { %513 = vmatprep.subr.bf16.mxu0 %v988_v0 }
  0x4e   :  { %465 = vmatpush1.bf16.msra.mxu1 %v914_v36 }
  0x4f   :  { %514 = vmatpush1.bf16.msra.mxu0 %v907_v35  ;;  %466 = vmatprep.subr.bf16.mxu1 %v916_v39 }
  0x50   :  { %515 = vmatprep.subr.bf16.mxu0 %v988_v0 }
  0x52   :  { %467 = vmatpush1.bf16.msra.mxu1 %v918_v40 }
  0x53   :  { %516 = vmatpush1.bf16.msra.mxu0 %v911_v37  ;;  %468 = vmatprep.subr.bf16.mxu1 %v920_v42  ;;  %v230_v37 = vld [vmem:[#allocation4 + $0x1] ss:$4 sm:$0x7] }
  0x54   :  { %517 = vmatprep.subr.bf16.mxu0 %v988_v0  ;;  %v1233_v39 = vrot.slane %v230_v37, %v1191_v51 }
  0x56   :  { %469 = vmatpush1.bf16.msra.mxu1 %v922_v43 }
  0x57   :  { %518 = vmatpush1.bf16.msra.mxu0 %v915_v38  ;;  %638 = vmatprep.subr.bf16.mxu1 %v926_v45  ;;  %v243_v38 = vrot.slane %v230_v37, %v242_v34 }
  0x58   :  { %519 = vmatprep.subr.bf16.mxu0 %v988_v0 }
  0x5b   :  { %520 = vmatpush1.bf16.msra.mxu0 %v919_v41 }
  0x5c   :  { %521 = vmatprep.subr.bf16.mxu0 %v988_v0 }
  0x5f   :  { %522 = vmatpush1.bf16.msra.mxu0 %v923_v44  ;;  %v573_v44 = vld [vmem:[#allocation4 + $0x2] ss:$4 sm:$0x7] }
  0x60   :  { %850 = vmatprep.subr.bf16.mxu0 %v927_v46 }
 0x105   :  { %v150_v54 = vpop.f32.mrb[0].mxu0 }
 0x106   :  { %v151_v55 = vadd.f32 %v150_v54, %v62_v52  ;;  %v152_v56 = vpop.f32.mrb[1].mxu0 }
 0x107   :  { %v153_v57 = vadd.f32 %v152_v56, %v66_v53  ;;  %v154_v58 = vpop.f32.mrb[2].mxu0  ;;  %v1238_v56 = vrot.slane %v573_v44, %v1188_v49 }
 0x108   :  { %v155_v59 = vadd.f32 %v154_v58, %v62_v52  ;;  %v156_v60 = vpop.f32.mrb[3].mxu0  ;;  %v169_v62 = vmax.f32 %v151_v55, 0.0 }
 0x109   :  { %v157_v61 = vadd.f32 %v156_v60, %v66_v53  ;;  %v170_v1 = vmax.f32 %v153_v57, 0.0  ;;  %v586_v57 = vrot.slane %v573_v44, %v242_v34 }
 0x10a   :  { %v171_v63 = vmax.f32 %v155_v59, 0.0  ;;  %v1241_v59 = vrot.slane %v573_v44, %v1191_v51 }
 0x10b   :  { %v172_v2 = vmax.f32 %v157_v61, 0.0 }
 0x10c   :  { %v177_v3 = vpack.c.bf16 %v171_v63, %v169_v62 }
 0x10d   :  { %v160_v4 = vpop.f32.mrb[4].mxu0  ;;  %v178_v5 = vpack.c.bf16 %v172_v2, %v170_v1 }
 0x10e   :  { %v161_v7 = vadd.f32 %v160_v4, %v62_v52  ;;  %v162_v8 = vpop.f32.mrb[5].mxu0 }
 0x10f   :  { %v163_v12 = vadd.f32 %v162_v8, %v66_v53  ;;  %v164_v13 = vpop.f32.mrb[6].mxu0  ;;  %828 = vmatprep.mubr.msk.bf16.mxu1 %vm439_vm1, %v178_v5  ;;  %830 = vmatprep.mubr.msk.bf16.mxu0 %vm439_vm1, %v178_v5 }
 0x110   :  { %v165_v14 = vadd.f32 %v164_v13, %v62_v52  ;;  %v166_v15 = vpop.f32.mrb[7].mxu0  ;;  %479 = vmatmul.mubr.bf16.vlgmr.msra.gmra.mrb[0].mxu1 %v177_v3  ;;  %532 = vmatmul.mubr.bf16.vlgmr.msra.gmra.mrb[8].mxu0 %v177_v3  ;;  %v173_v19 = vmax.f32 %v161_v7, 0.0 }
 0x111   :  { %v167_v16 = vadd.f32 %v166_v15, %v66_v53  ;;  %639 = vmatpush1.bf16.msra.mxu1 %v924_v6  ;;  %851 = vmatpush3.bf16.msra.mxu0 %v927_v46  ;;  %v174_v23 = vmax.f32 %v163_v12, 0.0 }
 0x112   :  { %v175_v20 = vmax.f32 %v165_v14, 0.0  ;;  %640 = vmatprep.subr.bf16.mxu1 %v930_v9  ;;  %852 = vmatprep.subr.bf16.mxu0 %v931_v10 }
 0x113   :  { %v176_v24 = vmax.f32 %v167_v16, 0.0 }
 0x114   :  { %v179_v25 = vpack.c.bf16 %v175_v20, %v173_v19 }
 0x115   :  { %v180_v26 = vpack.c.bf16 %v176_v24, %v174_v23  ;;  %641 = vmatpush1.bf16.msra.mxu1 %v928_v17  ;;  %853 = vmatpush3.bf16.msra.mxu0 %v931_v10 }
 0x116   :  { %642 = vmatprep.subr.bf16.mxu1 %v934_v21  ;;  %854 = vmatprep.subr.bf16.mxu0 %v935_v22 }
 0x117   :  { %829 = vmatprep.mubr.msk.bf16.mxu1 %vm439_vm1, %v180_v26  ;;  %831 = vmatprep.mubr.msk.bf16.mxu0 %vm439_vm1, %v180_v26 }
 0x118   :  { %489 = vmatmul.mubr.bf16.gmra.mrb[4].mxu1 %v179_v25  ;;  %540 = vmatmul.mubr.bf16.gmra.mrb[12].mxu0 %v179_v25 }
 0x119   :  { %643 = vmatpush1.bf16.msra.mxu1 %v932_v27  ;;  %855 = vmatpush3.bf16.msra.mxu0 %v935_v22 }
 0x11a   :  { %670 = vmatprep.mubr.bf16.mxu1 %v988_v0  ;;  %856 = vmatprep.mubr.msk.bf16.mxu0 %vm109_vm0, %v1059_v11 }
 0x120   :  { %841 = vmatmul.mubr.msk.bf16.vlgmr.msra.gmra.mrb[8].mxu1 %vm109_vm0, %v1059_v11  ;;  %857 = vmatmul.mubr.msk.bf16.vlgmr.msra.gmra.mrb[16].mxu0 %vm109_vm0, %v1087_v18  ;;  %v235_v11 = vrot.slane %v230_v37, %v1188_v49 }
 0x121   :  { %680 = vmatprep.mubr.bf16.mxu1 %v988_v0 }
 0x128   :  { %842 = vmatmul.mubr.msk.bf16.gmra.mrb[12].mxu1 %vm109_vm0, %v1087_v18 }
 0x1e3   :  { %v480_v28 = vpop.f32.mrb[0].mxu1  ;;  %v533_v29 = vpop.f32.mrb[8].mxu0 }
 0x1e4   :  { %v482_v30 = vpop.f32.mrb[1].mxu1  ;;  %v535_v31 = vpop.f32.mrb[9].mxu0  ;;  %v481_v45 = vadd.f32 %v480_v28, %v235_v11  ;;  %v534_v46 = vadd.f32 %v533_v29, %v243_v38 }
 0x1e5   :  { %v484_v32 = vpop.f32.mrb[2].mxu1  ;;  %v536_v33 = vpop.f32.mrb[10].mxu0  ;;  %v483_v50 = vadd.f32 %v482_v30, %v1233_v39 }
 0x1e6   :  { %v486_v35 = vpop.f32.mrb[3].mxu1  ;;  %v538_v36 = vpop.f32.mrb[11].mxu0  ;;  %v485_v52 = vadd.f32 %v484_v32, %v235_v11  ;;  %v537_v53 = vadd.f32 %v536_v33, %v243_v38  ;;  %v548_v60 = vmax.f32 %v481_v45, 0.0  ;;  %v550_v61 = vmax.f32 %v534_v46, 0.0 }
 0x1e7   :  { %v487_v54 = vadd.f32 %v486_v35, %v1233_v39  ;;  %v549_v62 = vmax.f32 %v483_v50, 0.0 }
 0x1e8   :  { %v551_v63 = vmax.f32 %v485_v52, 0.0  ;;  %v553_v1 = vmax.f32 %v537_v53, 0.0 }
 0x1e9   :  { %v552_v2 = vmax.f32 %v487_v54, 0.0 }
 0x1eb   :  { %v490_v0 = vpop.f32.mrb[4].mxu1  ;;  %v541_v40 = vpop.f32.mrb[12].mxu0 }
 0x1ec   :  { %v492_v18 = vpop.f32.mrb[5].mxu1  ;;  %v543_v41 = vpop.f32.mrb[13].mxu0  ;;  %v542_v55 = vadd.f32 %v541_v40, %v243_v38  ;;  %v491_v5 = vadd.f32 %v490_v0, %v235_v11 }
 0x1ed   :  { %v494_v42 = vpop.f32.mrb[6].mxu1  ;;  %v544_v43 = vpop.f32.mrb[14].mxu0  ;;  %v493_v10 = vadd.f32 %v492_v18, %v1233_v39 }
 0x1ee   :  { %v496_v47 = vpop.f32.mrb[7].mxu1  ;;  %v546_v48 = vpop.f32.mrb[15].mxu0  ;;  %v545_v58 = vadd.f32 %v544_v43, %v243_v38  ;;  %v556_v6 = vmax.f32 %v542_v55, 0.0  ;;  %v495_v35 = vadd.f32 %v494_v42, %v235_v11  ;;  %v554_v18 = vmax.f32 %v491_v5, 0.0 }
 0x1ef   :  { %v497_v38 = vadd.f32 %v496_v47, %v1233_v39  ;;  %v555_v42 = vmax.f32 %v493_v10, 0.0 }
 0x1f0   :  { %v559_v12 = vmax.f32 %v545_v58, 0.0  ;;  %v557_v45 = vmax.f32 %v495_v35, 0.0 }
 0x1f1   :  { %v558_v50 = vmax.f32 %v497_v38, 0.0 }
 0x1f3   :  { %v672_v3 = vpop.f32.mrb[8].mxu1  ;;  %v858_v4 = vpop.f32.mrb[16].mxu0 }
 0x1f4   :  { %v673_v7 = vadd.f32 %v672_v3, %v1238_v56  ;;  %v734_v8 = vadd.f32 %v858_v4, %v586_v57  ;;  %v674_v49 = vpop.f32.mrb[9].mxu1  ;;  %v725_v9 = vpop.f32.mrb[17].mxu0 }
 0x1f5   :  { %v675_v51 = vadd.f32 %v674_v49, %v1241_v59  ;;  %v726_v13 = vadd.f32 %v725_v9, %v586_v57  ;;  %v676_v14 = vpop.f32.mrb[10].mxu1  ;;  %v859_v15 = vpop.f32.mrb[18].mxu0 }
 0x1f6   :  { %v740_v16 = vadd.f32 %v673_v7, %v548_v60  ;;  %v748_v17 = vadd.f32 %v734_v8, %v556_v6  ;;  %v677_v19 = vadd.f32 %v676_v14, %v1238_v56  ;;  %v737_v20 = vadd.f32 %v859_v15, %v586_v57  ;;  %v678_v21 = vpop.f32.mrb[11].mxu1  ;;  %v728_v22 = vpop.f32.mrb[19].mxu0 }
 0x1f7   :  { %v741_v23 = vadd.f32 %v675_v51, %v549_v62  ;;  %v742_v24 = vadd.f32 %v726_v13, %v550_v61  ;;  %v679_v25 = vadd.f32 %v678_v21, %v1241_v59  ;;  %v729_v26 = vadd.f32 %v728_v22, %v586_v57 }
 0x1f8   :  { %v752_v27 = vmax.f32 %v740_v16, 0.0  ;;  %v760_v28 = vmax.f32 %v748_v17, 0.0  ;;  %v743_v29 = vadd.f32 %v677_v19, %v551_v63  ;;  %v751_v30 = vadd.f32 %v737_v20, %v559_v12 }
 0x1f9   :  { %v753_v31 = vmax.f32 %v741_v23, 0.0  ;;  %v754_v32 = vmax.f32 %v742_v24, 0.0  ;;  %v744_v33 = vadd.f32 %v679_v25, %v552_v2  ;;  %v745_v34 = vadd.f32 %v729_v26, %v553_v1 }
 0x1fa   :  { %764 = vst [vmem:[%s1294_s5] sm:$0xff] %v752_v27  ;;  %772 = vst [vmem:[%s1294_s5 + $0x40] sm:$0xff] %v760_v28  ;;  %v755_v36 = vmax.f32 %v743_v29, 0.0  ;;  %v763_v37 = vmax.f32 %v751_v30, 0.0 }
 0x1fb   :  { %765 = vst [vmem:[%s1294_s5 + $0x8] sm:$0xff] %v753_v31  ;;  %766 = vst [vmem:[%s1294_s5 + $0x10] sm:$0xff] %v754_v32  ;;  %v756_v11 = vmax.f32 %v744_v33, 0.0  ;;  %v757_v0 = vmax.f32 %v745_v34, 0.0  ;;  %v682_v40 = vpop.f32.mrb[12].mxu1 }
 0x1fc   :  { %767 = vst [vmem:[%s1294_s5 + $0x18] sm:$0xff] %v755_v36  ;;  %775 = vst [vmem:[%s1294_s5 + $0x58] sm:$0xff] %v763_v37  ;;  %v683_v39 = vadd.f32 %v682_v40, %v1238_v56  ;;  %v684_v41 = vpop.f32.mrb[13].mxu1 }
 0x1fd   :  { %768 = vst [vmem:[%s1294_s5 + $0x20] sm:$0xff] %v756_v11  ;;  %769 = vst [vmem:[%s1294_s5 + $0x28] sm:$0xff] %v757_v0  ;;  %v685_v43 = vadd.f32 %v684_v41, %v1241_v59  ;;  %v686_v44 = vpop.f32.mrb[14].mxu1 }
 0x1fe   :  { %v746_v46 = vadd.f32 %v683_v39, %v554_v18  ;;  %v687_v47 = vadd.f32 %v686_v44, %v1238_v56  ;;  %v688_v48 = vpop.f32.mrb[15].mxu1 }
 0x1ff   :  { %v747_v52 = vadd.f32 %v685_v43, %v555_v42  ;;  %v689_v53 = vadd.f32 %v688_v48, %v1241_v59 }
 0x200   :  { %v758_v54 = vmax.f32 %v746_v46, 0.0  ;;  %v749_v55 = vadd.f32 %v687_v47, %v557_v45 }
 0x201   :  { %v759_v57 = vmax.f32 %v747_v52, 0.0  ;;  %v750_v58 = vadd.f32 %v689_v53, %v558_v50 }
 0x202   :  { %770 = vst [vmem:[%s1294_s5 + $0x30] sm:$0xff] %v758_v54  ;;  %v761_v60 = vmax.f32 %v749_v55, 0.0 }
 0x203   :  { %771 = vst [vmem:[%s1294_s5 + $0x38] sm:$0xff] %v759_v57  ;;  %v762_v61 = vmax.f32 %v750_v58, 0.0 }
 0x204   :  { %773 = vst [vmem:[%s1294_s5 + $0x48] sm:$0xff] %v761_v60 }
 0x205   :  { %774 = vst [vmem:[%s1294_s5 + $0x50] sm:$0xff] %v762_v61 }
 0x206   :  { %780 = vsyncpa [#allocation3], 1 }
 0x207   :  { %781 = vsyncpa [#allocation5], 1 }

</bundles_post_ra>
